<compile_context>
chip_gen: v7x
topology: tpu7x:2x2x1
jax: 0.10.0
libtpu: 0.0.40
codegen_flags: <defaults>
</compile_context>

<pallas_src>
import functools
from types import SimpleNamespace

import jax
import jax.numpy as jnp
from jax import lax
from jax.experimental import pallas as pl
from jax.experimental.pallas import tpu as pltpu


LANE = 128                      # lane-dense padding for node / feature dims
VMEM_LIMIT = 32 * 1024 * 1024   # raise v5e's 16 MiB scoped default (safe on all)


def _round_up(x, m):
    return ((x + m - 1) // m) * m


def _pick_tile(dim):
    """Largest of (512, 256, 128) dividing `dim` (dim is a multiple of 128)."""
    for t in (512, 256, 128):
        if dim % t == 0:
            return t
    return dim


def _agg_tile(n_pad, batch, f_out):
    """Â row/col tile for the aggregation kernel, fitted to a VMEM budget
    (safe for v7x's 64 MiB physical / 32 MiB scoped VMEM)."""
    for t in (512, 256, 128):
        if n_pad % t:
            continue
        vmem = (2 * t * t * 2                   # Â tile, bf16, double-buffered
                + 2 * batch * t * f_out * 2     # H block, bf16, double-buffered
                + 2 * batch * t * f_out * 4     # out block (worst case f32)
                + batch * t * f_out * 4)        # f32 accumulator scratch
        if vmem <= 12 * 1024 * 1024:
            return t
    return 128


def _pad2(a, rows, cols):
    return jnp.pad(a, ((0, rows - a.shape[0]), (0, cols - a.shape[1])))


def _pad_last2(a, rows, cols):
    pad = [(0, 0)] * (a.ndim - 2) + [(0, rows - a.shape[-2]),
                                     (0, cols - a.shape[-1])]
    return jnp.pad(a, pad)


# ---------------------------------------------------------------------------
# Pallas kernels
# ---------------------------------------------------------------------------
def _feat_kernel(x_ref, w_ref, o_ref, acc_ref):
    """Hoisted feature transform: H row-tile = X row-tile @ W."""
    k = pl.program_id(2)

    @pl.when(k == 0)
    def _init():
        acc_ref[...] = jnp.zeros_like(acc_ref)

    acc_ref[...] += jnp.dot(x_ref[...], w_ref[...],
                            preferred_element_type=jnp.float32)

    @pl.when(k == pl.num_programs(2) - 1)
    def _fin():
        o_ref[...] = acc_ref[...].astype(o_ref.dtype)


def _feat_add_kernel(x_ref, y_ref, w_ref, o_ref, acc_ref):
    """Fused feature transform: H row-tile = (X + Y) row-tile @ W.

    Used for the mu/sigma layer so hidden1 = hidden_x + hidden_e never hits
    HBM (Y = hidden_x is broadcast over the copy axis via its index_map)."""
    k = pl.program_id(2)

    @pl.when(k == 0)
    def _init():
        acc_ref[...] = jnp.zeros_like(acc_ref)

    acc_ref[...] += jnp.dot(x_ref[...] + y_ref[...], w_ref[...],
                            preferred_element_type=jnp.float32)

    @pl.when(k == pl.num_programs(2) - 1)
    def _fin():
        o_ref[...] = acc_ref[...].astype(o_ref.dtype)


def batched_feat(x, w, *, out_dtype, tm, tk, add=None):
    """H[b] = (x[b] (+ add[0])) @ w, computed ONCE per copy (hoisted)."""
    x = x.astype(jnp.bfloat16)
    w = w.astype(jnp.bfloat16)
    batch, n_pad, f_in = x.shape
    f_out = w.shape[1]
    grid = (n_pad // tm, batch, f_in // tk)      # row tiles lead (v7x megacore)

    x_spec = pl.BlockSpec((None, tm, tk), lambda i, b, k: (b, i, k))
    w_spec = pl.BlockSpec((tk, f_out), lambda i, b, k: (k, 0))
    out_spec = pl.BlockSpec((None, tm, f_out), lambda i, b, k: (b, i, 0))

    if add is None:
        kernel, in_specs, args = _feat_kernel, [x_spec, w_spec], (x, w)
    else:
        add = add.astype(jnp.bfloat16)
        add_spec = pl.BlockSpec((None, tm, tk), lambda i, b, k: (0, i, k))
        kernel = _feat_add_kernel
        in_specs, args = [x_spec, add_spec, w_spec], (x, add, w)

    return pl.pallas_call(
        kernel,
        out_shape=jax.ShapeDtypeStruct((batch, n_pad, f_out), out_dtype),
        grid=grid,
        in_specs=in_specs,
        out_specs=out_spec,
        scratch_shapes=[pltpu.VMEM((tm, f_out), jnp.float32)],
        compiler_params=pltpu.CompilerParams(
            dimension_semantics=("parallel", "parallel", "arbitrary"),
            vmem_limit_bytes=VMEM_LIMIT),
    )(*args)


def _agg_kernel(a_ref, h_ref, b_ref, o_ref, acc_ref, *, apply_relu, n_copies):
    """out[c] = relu?( Â @ H[c] + bias ) for every copy c.

    All copies share the SAME Â (i, k) tile, so Â is DMA'd once per grid step
    instead of once per copy.  Padded rows end up equal to the (zero) bias and
    are dropped by the final host-side slice."""
    k = pl.program_id(1)

    @pl.when(k == 0)
    def _init():
        acc_ref[...] = jnp.zeros_like(acc_ref)

    # One MXU matmul per copy against the same resident Â tile.
    for c in range(n_copies):
        acc_ref[c] = acc_ref[c] + jnp.dot(a_ref[...], h_ref[c],
                                          preferred_element_type=jnp.float32)

    @pl.when(k == pl.num_programs(1) - 1)
    def _fin():
        bias = b_ref[...]                        # (1, f_out); zeros in SIG-VAE
        for c in range(n_copies):
            out = acc_ref[c] + bias
            if apply_relu:
                out = jnp.maximum(out, 0.0)
            o_ref[c] = out.astype(o_ref.dtype)


def batched_agg(a_pad, h, bias, *, apply_relu, out_dtype, tile):
    """out[c] = relu?( Â @ H[c] + bias )   (Â streamed once, reused by copies)."""
    h = h.astype(jnp.bfloat16)
    batch, n_pad, f_out = h.shape
    grid = (n_pad // tile, n_pad // tile)        # (row tiles, reduction tiles)

    kernel = functools.partial(_agg_kernel, apply_relu=apply_relu,
                               n_copies=batch)
    return pl.pallas_call(
        kernel,
        out_shape=jax.ShapeDtypeStruct((batch, n_pad, f_out), out_dtype),
        grid=grid,
        in_specs=[
            pl.BlockSpec((tile, tile), lambda i, k: (i, k)),             # Â
            pl.BlockSpec((batch, tile, f_out), lambda i, k: (0, k, 0)),  # H
            pl.BlockSpec((1, f_out), lambda i, k: (0, 0)),               # bias
        ],
        out_specs=pl.BlockSpec((batch, tile, f_out), lambda i, k: (0, i, 0)),
        scratch_shapes=[pltpu.VMEM((batch, tile, f_out), jnp.float32)],
        compiler_params=pltpu.CompilerParams(
            dimension_semantics=("parallel", "arbitrary"),
            vmem_limit_bytes=VMEM_LIMIT),
    )(a_pad, h, bias)


def _ip_decoder_kernel(zi_ref, zj_ref, o_ref):
    """adj tile = sigmoid(Z_i @ Z_j^T), stored bf16 (writeback-bound)."""
    logits = lax.dot_general(
        zi_ref[...], zj_ref[...],
        dimension_numbers=(((1,), (1,)), ((), ())),
        preferred_element_type=jnp.float32)
    o_ref[...] = jax.nn.sigmoid(logits).astype(o_ref.dtype)


def ip_decoder(z_pad, *, tile):
    """adj[j] = sigmoid(Z[j] @ Z[j]^T) for every latent copy j."""
    batch, n_pad, d = z_pad.shape
    nt = n_pad // tile
    return pl.pallas_call(
        _ip_decoder_kernel,
        out_shape=jax.ShapeDtypeStruct((batch, n_pad, n_pad), jnp.bfloat16),
        grid=(nt, batch, nt),                    # row tiles lead (v7x megacore)
        in_specs=[
            pl.BlockSpec((None, tile, d), lambda i, b, j: (b, i, 0)),
            pl.BlockSpec((None, tile, d), lambda i, b, j: (b, j, 0)),
        ],
        out_specs=pl.BlockSpec((None, tile, tile), lambda i, b, j: (b, i, j)),
        compiler_params=pltpu.CompilerParams(
            dimension_semantics=("parallel", "parallel", "parallel"),
            vmem_limit_bytes=VMEM_LIMIT),
    )(z_pad, z_pad)


# ---------------------------------------------------------------------------
# Plain-JAX glue
# ---------------------------------------------------------------------------
def gcn_normalized_adj(edge_index, num_nodes):
    """Dense Â = D̂^{-1/2}(A+I)D̂^{-1/2}, matching PyG gcn_norm semantics."""
    # TODO(synk): for genuinely sparse / very large graphs replace this dense
    # O(N^2) Â with a PrefetchScalarGridSpec gather/SpMM formulation.
    src, dst = edge_index[0], edge_index[1]
    a = jnp.zeros((num_nodes, num_nodes), jnp.float32)
    a = a.at[dst, src].add(1.0)
    a = a + jnp.eye(num_nodes, dtype=jnp.float32)   # add self-loops
    deg = a.sum(axis=1)
    dinv_sqrt = jnp.where(deg > 0, lax.rsqrt(deg), 0.0)
    return dinv_sqrt[:, None] * a * dinv_sqrt[None, :]


class SIGVAE:
    """JAX/Pallas equivalent of the PyTorch SIGVAE forward pass (inference)."""

    def __init__(self, config, key):
        self.config = config
        self.in_channels = config.input_size
        self.out_channels = config.output_size
        self.e_channels = config.noise_size
        self.hidden_dim = config.hidden_size
        self.K = config.K
        self.J = config.copyJ
        self.ndist = config.ndist
        self.reweight = ((self.e_channels + self.hidden_dim) /
                         (self.in_channels + self.hidden_dim)) ** 0.5

        # Lane-dense padded feature dims.
        self.fin_p = _round_up(self.in_channels, LANE)
        self.fe_p = _round_up(self.e_channels, LANE)
        self.fh_p = _round_up(self.hidden_dim, LANE)
        self.fo_p = _round_up(self.out_channels, LANE)        # decoder contraction
        self.fms_p = _round_up(2 * self.out_channels, LANE)   # packed mu|sigma

        k_e, k_1, k_mu, k_sig, k_rk = jax.random.split(key, 5)

        def glorot(k, fi, fo):
            lim = (6.0 / (fi + fo)) ** 0.5
            return jax.random.uniform(k, (fi, fo), jnp.float32, -lim, lim)

        # Zero-padded GCNConv weights (bf16 for the MXU feed) + zero biases.
        self.w_e = _pad2(glorot(k_e, self.e_channels, self.hidden_dim),
                         self.fe_p, self.fh_p).astype(jnp.bfloat16)
        self.b_e = jnp.zeros((1, self.fh_p), jnp.float32)
        self.w_1 = _pad2(glorot(k_1, self.in_channels, self.hidden_dim),
                         self.fin_p, self.fh_p).astype(jnp.bfloat16)
        self.b_1 = jnp.zeros((1, self.fh_p), jnp.float32)
        # gcn_mu / gcn_sigma packed into ONE 128-lane block:
        #   cols [0:O] = W_mu, cols [O:2O] = W_sigma, rest zero-pad.
        w_mu = glorot(k_mu, self.hidden_dim, self.out_channels)
        w_sig = glorot(k_sig, self.hidden_dim, self.out_channels)
        self.w_ms = _pad2(jnp.concatenate([w_mu, w_sig], axis=1),
                          self.fh_p, self.fms_p).astype(jnp.bfloat16)
        self.b_ms = jnp.zeros((1, self.fms_p), jnp.float32)
        # GraphDecoder rk logits (SIG-VAE init: uniform(-6, 0)).
        self.rk_lgt = jax.random.uniform(k_rk, (1, self.out_channels),
                                         jnp.float32, -6.0, 0.0)

    # -- noise sampling (torch.distributions -> jax.random) -------------------
    def _sample_noise(self, key, n_noise_nodes):
        shape = (self.K + self.J, n_noise_nodes, self.e_channels)
        if self.ndist == 'Bernoulli':
            e = jax.random.bernoulli(key, 0.5, shape).astype(jnp.float32)
        elif self.ndist == 'Normal':
            e = jax.random.normal(key, shape, jnp.float32)
        elif self.ndist == 'Exponential':
            e = jax.random.exponential(key, shape).astype(jnp.float32)
        else:
            raise ValueError(f"unknown ndist {self.ndist!r}")
        return e * self.reweight        # e.squeeze(-1).mul(reweight)

    # -- Pallas forward --------------------------------------------------------
    def __call__(self, x, edge_index, key):
        n = x.shape[0]
        k_e, k_eps = jax.random.split(key)
        n_pad = _round_up(n, LANE)

        # Dense normalized Â: built once, streamed bf16 (only O(N^2) operand).
        a_hat = gcn_normalized_adj(edge_index, n)
        a_pad = _pad2(a_hat, n_pad, n_pad).astype(jnp.bfloat16)

        n_copies = self.K + self.J
        t_agg = _agg_tile(n_pad, n_copies, max(self.fh_p, self.fms_p))

        # ---- gcn_1: hoisted feature transform (once), Â aggregation + ReLU ---
        # TODO(synk): with identity node features X @ W1 == W1; the hoisted
        # transform already reduces this to a single small matmul so it is not
        # special-cased here.
        x_pad = _pad2(x.astype(jnp.float32), n_pad, self.fin_p)[None]
        hx_feat = batched_feat(x_pad, self.w_1, out_dtype=jnp.bfloat16,
                               tm=t_agg, tk=_pick_tile(self.fin_p))
        hx = batched_agg(a_pad, hx_feat, self.b_1, apply_relu=True,
                         out_dtype=jnp.bfloat16, tile=t_agg)     # [1,Np,Hp]

        # ---- noise branch: gcn_e(e) ------------------------------------------
        # SIGVAE samples noise with node dim = x.shape[1] (identity features).
        e = self._sample_noise(k_e, x.shape[1])                  # [K+J,N,E]
        e_pad = _pad_last2(e, n_pad, self.fe_p)
        he_feat = batched_feat(e_pad, self.w_e, out_dtype=jnp.bfloat16,
                               tm=t_agg, tk=_pick_tile(self.fe_p))
        he = batched_agg(a_pad, he_feat, self.b_e, apply_relu=False,
                         out_dtype=jnp.bfloat16, tile=t_agg)     # [K+J,Np,Hp]

        hidden_x = hx[0, :n, :self.hidden_dim].astype(jnp.float32)
        hidden_e = he[:, :n, :self.hidden_dim].astype(jnp.float32)
        p_signal = jnp.mean(hidden_x ** 2)
        p_noise = jnp.mean(hidden_e ** 2, axis=(-2, -1))
        snr = p_signal / p_noise

        # ---- fused gcn_mu / gcn_sigma ----------------------------------------
        # hidden1 = hx + he is fused into the feature transform (never hits
        # HBM); mu|sigma weights are packed into one 128-lane output block.
        hms_feat = batched_feat(he, self.w_ms, out_dtype=jnp.bfloat16,
                                tm=t_agg, tk=_pick_tile(self.fh_p), add=hx)
        ms = batched_agg(a_pad, hms_feat, self.b_ms, apply_relu=False,
                         out_dtype=jnp.float32, tile=t_agg)      # [K+J,Np,128]
        o = self.out_channels
        mu = ms[:, :n, :o]
        sigma = ms[:, :n, o:2 * o]

        emb_mu = mu[self.K:]
        emb_logvar = sigma[self.K:]
        std = jnp.exp(emb_logvar / 2.0)
        eps = jax.random.normal(k_eps, std.shape, jnp.float32)
        z = eps * std + emb_mu                                   # [J,N,O]

        # ---- GraphDecoder (gdc='ip'); dropout is identity at inference --------
        # TODO(synk): GraphDecoder definition was not included in the spec;
        # standard SIG-VAE inner-product decoder implemented here.
        rk = jax.nn.sigmoid(self.rk_lgt) ** 0.5
        z_scaled = z * rk
        z_dec = _pad_last2(z_scaled, n_pad, self.fo_p).astype(jnp.bfloat16)
        adj_pad = ip_decoder(z_dec, tile=_pick_tile(n_pad))      # bf16
        adj_ = adj_pad[:, :n, :n]

        return adj_, mu, sigma, z, z_scaled, eps, rk, snr

    # -- pure-JAX mirror (same sampling, same bf16 rounding) for checking ------
    def reference(self, x, edge_index, key):
        n = x.shape[0]
        k_e, k_eps = jax.random.split(key)
        bf = lambda t: t.astype(jnp.bfloat16).astype(jnp.float32)

        a = bf(gcn_normalized_adj(edge_index, n))
        w1 = self.w_1[:self.in_channels, :self.hidden_dim].astype(jnp.float32)
        we = self.w_e[:self.e_channels, :self.hidden_dim].astype(jnp.float32)
        o = self.out_channels
        wmu = self.w_ms[:self.hidden_dim, :o].astype(jnp.float32)
        wsig = self.w_ms[:self.hidden_dim, o:2 * o].astype(jnp.float32)
        b1 = self.b_1[:, :self.hidden_dim]
        be = self.b_e[:, :self.hidden_dim]
        bmu = self.b_ms[:, :o]
        bsig = self.b_ms[:, o:2 * o]

        hx = bf(jnp.maximum(a @ bf(bf(x) @ w1) + b1, 0.0))
        e = self._sample_noise(k_e, x.shape[1])
        he = bf(a @ bf(bf(e) @ we) + be)

        p_signal = jnp.mean(hx ** 2)
        p_noise = jnp.mean(he ** 2, axis=(-2, -1))
        snr = p_signal / p_noise

        h1 = bf(hx + he)
        mu = a @ bf(h1 @ wmu) + bmu
        sigma = a @ bf(h1 @ wsig) + bsig

        emb_mu = mu[self.K:]
        emb_logvar = sigma[self.K:]
        std = jnp.exp(emb_logvar / 2.0)
        eps = jax.random.normal(k_eps, std.shape, jnp.float32)
        z = eps * std + emb_mu

        rk = jax.nn.sigmoid(self.rk_lgt) ** 0.5
        z_scaled = z * rk
        zb = bf(z_scaled)
        adj_ = jax.nn.sigmoid(jnp.einsum("jnd,jmd->jnm", zb, zb))
        return adj_, mu, sigma, z, z_scaled, eps, rk, snr


if __name__ == "__main__":
    key = jax.random.PRNGKey(0)
    k_params, k_fwd = jax.random.split(key)

    num_nodes = 16
    config = SimpleNamespace(
        input_size=num_nodes,   # SIGVAE convention: identity node features
        output_size=8,
        noise_size=4,
        hidden_size=32,
        dropout=0.0,
        ndist='Bernoulli',
        K=1,
        copyJ=2,
        tag='demo',
    )

    # Node features: identity (so x.shape[1] == num_nodes, as SIGVAE assumes).
    x = jnp.eye(num_nodes, dtype=jnp.float32)

    # Undirected ring graph as edge_index [2, 2N] (self-loops added in gcn_norm).
    fwd_src = jnp.arange(num_nodes, dtype=jnp.int32)
    fwd_dst = (fwd_src + 1) % num_nodes
    edge_index = jnp.stack(
        [jnp.concatenate([fwd_src, fwd_dst]),
         jnp.concatenate([fwd_dst, fwd_src])], axis=0)

    model = SIGVAE(config, k_params)

    adj_, mu, sigma, z, z_scaled, eps, rk, snr = model(x, edge_index, k_fwd)
    adj_ = jax.block_until_ready(adj_)

    KJ = config.K + config.copyJ
    J = config.copyJ
    assert adj_.shape == (J, num_nodes, num_nodes)
    assert mu.shape == (KJ, num_nodes, config.output_size)
    assert sigma.shape == (KJ, num_nodes, config.output_size)
    assert z.shape == (J, num_nodes, config.output_size)
    assert z_scaled.shape == (J, num_nodes, config.output_size)
    assert snr.shape == (KJ,)

    r_adj, r_mu, r_sigma, r_z, r_zs, r_eps, r_rk, r_snr = model.reference(
        x, edge_index, k_fwd)
    for name, got, ref in (("adj", adj_, r_adj), ("mu", mu, r_mu),
                           ("sigma", sigma, r_sigma), ("z", z, r_z),
                           ("snr", snr, r_snr)):
        err = float(jnp.max(jnp.abs(got.astype(jnp.float32) - ref)))
        assert jnp.allclose(got.astype(jnp.float32), ref,
                            atol=2e-2, rtol=2e-2), (name, err)

    print("KERNEL_OK")
</pallas_src>

<mosaic_0001>
module attributes {stable_mosaic.version = 11 : i64} {
  func.func @_feat_kernel(%arg0: i32, %arg1: i32, %arg2: i32, %arg3: memref<1x128x128xbf16, #tpu.memory_space<vmem>>, %arg4: memref<128x128xbf16, #tpu.memory_space<vmem>>, %arg5: memref<1x128x128xbf16, #tpu.memory_space<vmem>>, %arg6: memref<128x128xf32, #tpu.memory_space<vmem>>) attributes {dimension_semantics = [#tpu.dimension_semantics<parallel>, #tpu.dimension_semantics<parallel>, #tpu.dimension_semantics<arbitrary>], iteration_bounds = array<i64: 1, 1, 1>, scalar_prefetch = 0 : i64, scratch_operands = 1 : i64, tpu.core_type = #tpu.core_type<tc>, window_params = [{transform_indices = @transform_0, window_bounds = array<i64: 1, 128, 128>}, {transform_indices = @transform_1, window_bounds = array<i64: 128, 128>}, {transform_indices = @transform_2, window_bounds = array<i64: 1, 128, 128>}]} {
    %c0_i32 = arith.constant 0 : i32
    %0 = arith.cmpi eq, %arg2, %c0_i32 : i32
    %1 = arith.extui %0 : i1 to i32
    %c0_i32_0 = arith.constant 0 : i32
    %2 = arith.cmpi ne, %1, %c0_i32_0 : i32
    scf.if %2 {
      %cst_11 = arith.constant 0.000000e+00 : f32
      %13 = vector.broadcast %cst_11 : f32 to vector<128x128xf32>
      %c0_12 = arith.constant 0 : index
      %c0_13 = arith.constant 0 : index
      %14 = vector.load %arg6[%c0_12, %c0_13] : memref<128x128xf32, #tpu.memory_space<vmem>>, vector<128x128xf32>
      tpu.vector_store %arg6[%c0_12, %c0_13], %13 {strides = array<i32>} : memref<128x128xf32, #tpu.memory_space<vmem>>, vector<128x128xf32>,
    } else {
    }
    %c0 = arith.constant 0 : index
    %c0_1 = arith.constant 0 : index
    %3 = vector.load %arg6[%c0, %c0_1] : memref<128x128xf32, #tpu.memory_space<vmem>>, vector<128x128xf32>
    %c0_2 = arith.constant 0 : index
    %c0_3 = arith.constant 0 : index
    %c0_4 = arith.constant 0 : index
    %4 = vector.load %arg3[%c0_2, %c0_3, %c0_4] : memref<1x128x128xbf16, #tpu.memory_space<vmem>>, vector<1x128x128xbf16>
    %5 = vector.shape_cast %4 : vector<1x128x128xbf16> to vector<128x128xbf16>
    %c0_5 = arith.constant 0 : index
    %c0_6 = arith.constant 0 : index
    %6 = vector.load %arg4[%c0_5, %c0_6] : memref<128x128xbf16, #tpu.memory_space<vmem>>, vector<128x128xbf16>
    %cst = arith.constant dense<0.000000e+00> : vector<128x128xf32>
    %7 = tpu.matmul %5, %6, %cst {dimension_numbers = #tpu.dot_dimension_numbers<[1], [0], [0], [1], [0, 0, 1, 1], [], []>} : vector<128x128xbf16>, vector<128x128xbf16>, vector<128x128xf32> -> vector<128x128xf32>
    %8 = arith.addf %3, %7 : vector<128x128xf32>
    %c0_7 = arith.constant 0 : index
    %c0_8 = arith.constant 0 : index
    %9 = vector.load %arg6[%c0_7, %c0_8] : memref<128x128xf32, #tpu.memory_space<vmem>>, vector<128x128xf32>
    tpu.vector_store %arg6[%c0_7, %c0_8], %8 {strides = array<i32>} : memref<128x128xf32, #tpu.memory_space<vmem>>, vector<128x128xf32>,
    %c0_i32_9 = arith.constant 0 : i32
    %10 = arith.cmpi eq, %arg2, %c0_i32_9 : i32
    %11 = arith.extui %10 : i1 to i32
    %c0_i32_10 = arith.constant 0 : i32
    %12 = arith.cmpi ne, %11, %c0_i32_10 : i32
    scf.if %12 {
      %c0_11 = arith.constant 0 : index
      %c0_12 = arith.constant 0 : index
      %13 = vector.load %arg6[%c0_11, %c0_12] : memref<128x128xf32, #tpu.memory_space<vmem>>, vector<128x128xf32>
      %14 = arith.truncf %13 : vector<128x128xf32> to vector<128x128xbf16>
      %c0_13 = arith.constant 0 : index
      %c0_14 = arith.constant 0 : index
      %c0_15 = arith.constant 0 : index
      %15 = vector.load %arg5[%c0_13, %c0_14, %c0_15] : memref<1x128x128xbf16, #tpu.memory_space<vmem>>, vector<1x128x128xbf16>
      %16 = vector.shape_cast %15 : vector<1x128x128xbf16> to vector<128x128xbf16>
      %17 = vector.shape_cast %14 : vector<128x128xbf16> to vector<1x128x128xbf16>
      tpu.vector_store %arg5[%c0_13, %c0_14, %c0_15], %17 {strides = array<i32>} : memref<1x128x128xbf16, #tpu.memory_space<vmem>>, vector<1x128x128xbf16>,
    } else {
    }
    return
  }
  func.func @transform_0(%arg0: i32, %arg1: i32, %arg2: i32) -> (i32, i32, i32) {
    %c0_i32 = arith.constant 0 : i32
    return %arg1, %arg0, %arg2 : i32, i32, i32
  }
  func.func @transform_1(%arg0: i32, %arg1: i32, %arg2: i32) -> (i32, i32) {
    %c0_i32 = arith.constant 0 : i32
    %c0_i32_0 = arith.constant 0 : i32
    return %arg2, %c0_i32 : i32, i32
  }
  func.func @transform_2(%arg0: i32, %arg1: i32, %arg2: i32) -> (i32, i32, i32) {
    %c0_i32 = arith.constant 0 : i32
    %c0_i32_0 = arith.constant 0 : i32
    return %arg1, %arg0, %c0_i32 : i32, i32, i32
  }
}

</mosaic_0001>

<bundles_post_ra>
// kernel: tpu_custom_call.1
= control target key start
LH: loop header
LB: loop body
LE: loop exit
PB: predicated region body
PF: predicated region fallthrough
CT: control target
= control target key end

     0   :  { %7 = vsyncpa [#allocation4], 0  ;;  %s768_s0 = inlined_call_operand.hbm [shape: bf16[1,128,128], index: 0, kind: input, shape index: {}]   ;;  %s769_s1 = inlined_call_operand.hbm [shape: bf16[128,128], index: 1, kind: input, shape index: {}]   ;;  %s770_s2 = inlined_call_operand.hbm [shape: bf16[1,128,128], index: 2, kind: output, shape index: {}]  }
   0x1   :  { %8 = vsyncpa [#allocation7], 0 }
   0x2   :  { %9 = vsyncpa [#allocation5], 0  ;;  %s703_s9 = smov [#allocation3]   ;;  %s631_s13 = scalar_lea.hbm %s768_s0, 1024 }
   0x3   :  { %s15_s10 = sshll.u32 %s703_s9, 4  ;;  %p632_p0 = scmp.ne.s32.totalorder %s768_s0, %s631_s13  ;;  %s16_s10 = int_to_ptr.vmem [resolvable:$true] %s15_s10 }
   0x4   :  { %p635_p1 = scmp.lt.u32.totalorder %s631_s13, %s768_s0 }
   0x6   :  { %p637_p2 = pnand %p635_p1, %p632_p0 }
   0x8   :  { %640 = shalt.err (!%p637_p2)
}
   0x9   :  { %s641_s18 = scalar_lea.vmem %s16_s10, 1024  ;;  %p646_p4 = scmp.lt.s32.totalorder %s16_s10, %s16_s10 }
   0xa   :  { %p642_p3 = scmp.ne.s32.totalorder %s16_s10, %s641_s18  ;;  %p647_p5 = scmp.lt.s32.totalorder %s641_s18, %s641_s18 }
   0xc   :  { %p648_p6 = por %p647_p5, %p646_p4 }
   0xe   :  { %p649_p7 = pnand %p648_p6, %p642_p3 }
  0x10   :  { %652 = shalt.err (!%p649_p7)
}
  0x11   :  { %s704_s19 = smov 64   ;;  %s705_s20 = smov 4  }
  0x12   :  { %21 = dma.hbm_to_vmem [thread:$0]  %s768_s0, 1024, %s16_s10, [#allocation4], %s704_s19, %s704_s19, %s705_s20  }
  0x13   :  { %s706_s23 = smov [#allocation6]   ;;  %s653_s27 = scalar_lea.hbm %s769_s1, 1024 }
  0x14   :  { %s27_s24 = sshll.u32 %s706_s23, 4  ;;  %p654_p8 = scmp.ne.s32.totalorder %s769_s1, %s653_s27  ;;  %s28_s24 = int_to_ptr.vmem [resolvable:$true] %s27_s24 }
  0x15   :  { %p657_p9 = scmp.lt.u32.totalorder %s653_s27, %s769_s1 }
  0x17   :  { %p659_p10 = pnand %p657_p9, %p654_p8 }
  0x19   :  { %662 = shalt.err (!%p659_p10)
}
  0x1a   :  { %s663_s4 = scalar_lea.vmem %s28_s24, 1024  ;;  %p668_p12 = scmp.lt.s32.totalorder %s28_s24, %s28_s24 }
  0x1b   :  { %p664_p11 = scmp.ne.s32.totalorder %s28_s24, %s663_s4  ;;  %p669_p13 = scmp.lt.s32.totalorder %s663_s4, %s663_s4 }
  0x1d   :  { %p670_p0 = por %p669_p13, %p668_p12 }
  0x1f   :  { %p671_p1 = pnand %p670_p0, %p664_p11 }
  0x21   :  { %674 = shalt.err (!%p671_p1)
}
  0x22   :  { %33 = dma.hbm_to_vmem [thread:$0]  %s769_s1, 1024, %s28_s24, [#allocation7], %s704_s19, %s704_s19, %s705_s20  }
  0x23   :  { %697 = dma.done.wait [#allocation4], 1024  }
  0x24   :  { %698 = vsyncadd [#allocation4], 4294966272 }
  0x25   :  { %699 = dma.done.wait [#allocation7], 1024  }
  0x26   :  { %700 = vsyncadd [#allocation7], 4294966272  ;;  %v615_v0 = vld [vmem:[#allocation6] sm:$0xff]   ;;  %v616_v1 = vld [vmem:[#allocation6 + $0x8] sm:$0xff]   ;;  %s707_s1 = smov [#allocation8]  }
  0x27   :  { %562 = vmatprep.subr.bf16.mxu0 %v615_v0  ;;  %594 = vmatprep.subr.bf16.mxu1 %v615_v0  ;;  %v617_v2 = vld [vmem:[#allocation6 + $0x10] sm:$0xff]   ;;  %v618_v3 = vld [vmem:[#allocation6 + $0x18] sm:$0xff]   ;;  %v623_v4 = vld [vmem:[#allocation3] sm:$0xff]   ;;  %s438_s6 = sshll.u32 %s707_s1, 4  ;;  %s439_s6 = int_to_ptr.vmem [resolvable:$true] %s438_s6 }
  0x28   :  { %563 = vmatpush3.bf16.msra.mxu0 %v615_v0  ;;  %602 = vmatpush3.bf16.msra.mxu1 %v615_v0  ;;  %v624_v5 = vld [vmem:[#allocation3 + $0x20] sm:$0xff]   ;;  %v620_v7 = vld [vmem:[#allocation6 + $0x28] sm:$0xff]   ;;  %v621_v8 = vld [vmem:[#allocation6 + $0x30] sm:$0xff]   ;;  %s675_s7 = scalar_lea.vmem %s439_s6, 1024  ;;  %p680_p3 = scmp.lt.s32.totalorder %s439_s6, %s439_s6 }
  0x29   :  { %564 = vmatprep.subr.bf16.mxu0 %v616_v1  ;;  %595 = vmatprep.subr.bf16.mxu1 %v616_v1  ;;  %v619_v6 = vld [vmem:[#allocation6 + $0x20] sm:$0xff]   ;;  %v622_v9 = vld [vmem:[#allocation6 + $0x38] sm:$0xff]   ;;  %v625_v10 = vld [vmem:[#allocation3 + $0x8] sm:$0xff]   ;;  %p676_p2 = scmp.ne.s32.totalorder %s439_s6, %s675_s7  ;;  %p681_p4 = scmp.lt.s32.totalorder %s675_s7, %s675_s7 }
  0x2a   :  { %578 = vmatprep.mubr.bf16.mxu0 %v623_v4  ;;  %586 = vmatprep.mubr.bf16.mxu1 %v624_v5  ;;  %v626_v11 = vld [vmem:[#allocation3 + $0x28] sm:$0xff]   ;;  %v627_v12 = vld [vmem:[#allocation3 + $0x10] sm:$0xff]   ;;  %v629_v14 = vld [vmem:[#allocation3 + $0x18] sm:$0xff]  }
  0x2b   :  { %v628_v13 = vld [vmem:[#allocation3 + $0x30] sm:$0xff]   ;;  %v630_v15 = vld [vmem:[#allocation3 + $0x38] sm:$0xff]   ;;  %p682_p5 = por %p681_p4, %p680_p3 }
  0x2c   :  { %565 = vmatpush3.bf16.msra.mxu0 %v616_v1  ;;  %603 = vmatpush3.bf16.msra.mxu1 %v616_v1 }
  0x2d   :  { %566 = vmatprep.subr.bf16.mxu0 %v617_v2  ;;  %596 = vmatprep.subr.bf16.mxu1 %v617_v2  ;;  %p683_p6 = pnand %p682_p5, %p676_p2 }
  0x30   :  { %567 = vmatpush3.bf16.msra.mxu0 %v617_v2  ;;  %604 = vmatpush3.bf16.msra.mxu1 %v617_v2 }
  0x31   :  { %568 = vmatprep.subr.bf16.mxu0 %v618_v3  ;;  %597 = vmatprep.subr.bf16.mxu1 %v618_v3 }
  0x34   :  { %569 = vmatpush3.bf16.msra.mxu0 %v618_v3  ;;  %605 = vmatpush3.bf16.msra.mxu1 %v618_v3 }
  0x35   :  { %570 = vmatprep.subr.bf16.mxu0 %v619_v6  ;;  %598 = vmatprep.subr.bf16.mxu1 %v619_v6 }
  0x38   :  { %571 = vmatpush3.bf16.msra.mxu0 %v619_v6  ;;  %606 = vmatpush3.bf16.msra.mxu1 %v619_v6 }
  0x39   :  { %572 = vmatprep.subr.bf16.mxu0 %v620_v7  ;;  %599 = vmatprep.subr.bf16.mxu1 %v620_v7 }
  0x3c   :  { %573 = vmatpush3.bf16.msra.mxu0 %v620_v7  ;;  %607 = vmatpush3.bf16.msra.mxu1 %v620_v7 }
  0x3d   :  { %574 = vmatprep.subr.bf16.mxu0 %v621_v8  ;;  %600 = vmatprep.subr.bf16.mxu1 %v621_v8 }
  0x40   :  { %575 = vmatpush3.bf16.msra.mxu0 %v621_v8  ;;  %608 = vmatpush3.bf16.msra.mxu1 %v621_v8 }
  0x41   :  { %576 = vmatprep.subr.bf16.mxu0 %v622_v9  ;;  %601 = vmatprep.subr.bf16.mxu1 %v622_v9 }
  0x44   :  { %577 = vmatpush3.bf16.msra.mxu0 %v622_v9  ;;  %609 = vmatpush3.bf16.msra.mxu1 %v622_v9 }
  0x47   :  { %579 = vmatmul.mubr.bf16.vlgmr.msra.gmra.mrb[0].mxu0 %v625_v10  ;;  %587 = vmatmul.mubr.bf16.vlgmr.msra.gmra.mrb[0].mxu1 %v626_v11 }
  0x48   :  { %582 = vmatprep.mubr.bf16.mxu0 %v627_v12  ;;  %590 = vmatprep.mubr.bf16.mxu1 %v628_v13 }
  0x4f   :  { %583 = vmatmul.mubr.bf16.gmra.mrb[4].mxu0 %v629_v14  ;;  %591 = vmatmul.mubr.bf16.gmra.mrb[4].mxu1 %v630_v15 }
 0x11a   :  { %v580_v16 = vpop.f32.mrb[0].mxu0  ;;  %v588_v17 = vpop.f32.mrb[0].mxu1 }
 0x11b   :  { %v239_v18 = vpop.f32.mrb[1].mxu0  ;;  %v271_v19 = vpop.f32.mrb[1].mxu1 }
 0x11c   :  { %v581_v20 = vpop.f32.mrb[2].mxu0  ;;  %v589_v21 = vpop.f32.mrb[2].mxu1 }
 0x11d   :  { %v507_v22 = vpack.c.bf16 %v581_v20, %v580_v16  ;;  %v527_v23 = vpack.c.bf16 %v589_v21, %v588_v17  ;;  %v242_v24 = vpop.f32.mrb[3].mxu0  ;;  %v274_v25 = vpop.f32.mrb[3].mxu1 }
 0x11e   :  { %v502_v26 = vpack.c.bf16 %v242_v24, %v239_v18  ;;  %v522_v27 = vpack.c.bf16 %v274_v25, %v271_v19 }
 0x11f   :  { %539 = vst [vmem:[#allocation8 + $0x8] sm:$0xff] %v507_v22   ;;  %543 = vst [vmem:[#allocation8 + $0x28] sm:$0xff] %v527_v23  }
 0x120   :  { %503 = vst [vmem:[#allocation8] sm:$0xff] %v502_v26   ;;  %542 = vst [vmem:[#allocation8 + $0x20] sm:$0xff] %v522_v27  }
 0x122   :  { %v584_v28 = vpop.f32.mrb[4].mxu0  ;;  %v592_v29 = vpop.f32.mrb[4].mxu1 }
 0x123   :  { %v255_v30 = vpop.f32.mrb[5].mxu0  ;;  %v287_v31 = vpop.f32.mrb[5].mxu1 }
 0x124   :  { %v585_v32 = vpop.f32.mrb[6].mxu0  ;;  %v593_v33 = vpop.f32.mrb[6].mxu1 }
 0x125   :  { %v517_v34 = vpack.c.bf16 %v585_v32, %v584_v28  ;;  %v537_v35 = vpack.c.bf16 %v593_v33, %v592_v29  ;;  %v258_v36 = vpop.f32.mrb[7].mxu0  ;;  %v290_v37 = vpop.f32.mrb[7].mxu1 }
 0x126   :  { %v512_v38 = vpack.c.bf16 %v258_v36, %v255_v30  ;;  %v532_v39 = vpack.c.bf16 %v290_v37, %v287_v31 }
 0x127   :  { %541 = vst [vmem:[#allocation8 + $0x18] sm:$0xff] %v517_v34   ;;  %545 = vst [vmem:[#allocation8 + $0x38] sm:$0xff] %v537_v35  }
 0x128   :  { %540 = vst [vmem:[#allocation8 + $0x10] sm:$0xff] %v512_v38   ;;  %544 = vst [vmem:[#allocation8 + $0x30] sm:$0xff] %v532_v39  }
 0x129   :  { %686 = shalt.err (!%p683_p6)
}
 0x12a   :  { %s687_s10 = scalar_lea.hbm %s770_s2, 1024 }
 0x12b   :  { %p688_p7 = scmp.ne.s32.totalorder %s770_s2, %s687_s10  ;;  %p691_p8 = scmp.lt.u32.totalorder %s687_s10, %s770_s2 }
 0x12d   :  { %p693_p9 = pnand %p691_p8, %p688_p7 }
 0x12f   :  { %696 = shalt.err (!%p693_p9)
}
 0x130   :  { %444 = dma.vmem_to_hbm [thread:$0]  %s439_s6, 1024, %s770_s2, [#allocation5], %s704_s19, %s704_s19, %s705_s20  }
 0x131   :  { %701 = dma.done.wait [#allocation5], 1024  }
 0x132   :  { %702 = vsyncadd [#allocation5], 4294966272 }
 0x133   :  { %448 = vsyncpa [#allocation4], 1 }
 0x134   :  { %449 = vsyncpa [#allocation7], 1 }
 0x135   :  { %450 = vsyncpa [#allocation5], 1 }

</bundles_post_ra>
